<compile_context>
chip_gen: v7x
topology: tpu7x:2x2x1
jax: 0.10.0
libtpu: 0.0.40
codegen_flags: <defaults>
</compile_context>

<pallas_src>
import jax
import jax.numpy as jnp
import numpy as np
from jax.experimental import pallas as pl
from jax.experimental.pallas import tpu as pltpu

NUM_INPUTS = 73
HIDDEN = 64
DSET = [0] + list(range(49, 73))            # warehouseBase.dset (25 indices)
DSET_SIZE = len(DSET)

FNN1 = 512                                   # first fnn layer width
GATE_PAD = 128                               # each GRU gate padded to a full lane tile
GATE_BLOCK = 3 * GATE_PAD                    # 384
FUSED1 = FNN1 + GATE_BLOCK                   # 896 output lanes of the fused first matmul

HEAD_OUT = 192                               # packed lane-dense output width (was 256)
ACTOR_OFF = 0                                # out[:, 0:64]    -> hidden_actor
CRITIC_OFF = HIDDEN                          # out[:, 64:65]   -> hidden_critic
HXS_OFF = 128                                # out[:, 128:192] -> new rnn_hxs


# ----------------------------------------------------------------------------
# Deterministic parameter init (orthogonal weights, zero biases, like the module)
# ----------------------------------------------------------------------------
def _orthogonal(key, shape, gain=1.0):
    n_rows, n_cols = shape
    flat = (max(n_rows, n_cols), min(n_rows, n_cols))
    a = jax.random.normal(key, flat, dtype=jnp.float32)
    q, r = jnp.linalg.qr(a)
    q = q * jnp.sign(jnp.diagonal(r))
    if n_rows < n_cols:
        q = q.T
    return (gain * q[:n_rows, :n_cols]).astype(jnp.float32)


def init_raw_params(seed=0):
    """Raw (PyTorch-layout-equivalent) parameters."""
    keys = jax.random.split(jax.random.PRNGKey(seed), 8)
    g = float(np.sqrt(2.0))
    p = {}
    # fnn: Linear(73,512) -> ReLU -> Linear(512,256) -> ReLU -> Linear(256,64) -> ReLU
    p["w1"] = _orthogonal(keys[0], (FNN1, NUM_INPUTS), g).T          # (73, 512)
    p["b1"] = jnp.zeros((FNN1,), jnp.float32)
    p["w2"] = _orthogonal(keys[1], (256, FNN1), g).T                 # (512, 256)
    p["b2"] = jnp.zeros((256,), jnp.float32)
    p["w3"] = _orthogonal(keys[2], (HIDDEN, 256), g).T               # (256, 64)
    p["b3"] = jnp.zeros((HIDDEN,), jnp.float32)
    # GRU(input=25, hidden=64), PyTorch layout: weight_ih (3H, 25), weight_hh (3H, H)
    p["wih"] = _orthogonal(keys[3], (3 * HIDDEN, DSET_SIZE), 1.0)    # (192, 25)
    p["whh"] = _orthogonal(keys[4], (3 * HIDDEN, HIDDEN), 1.0)       # (192, 64)
    p["bih"] = jnp.zeros((3 * HIDDEN,), jnp.float32)                 # zero by module init
    p["bhh"] = jnp.zeros((3 * HIDDEN,), jnp.float32)
    # heads: actor Linear(2H, H), critic Linear(2H, 1) (stored transposed: (in, out))
    p["wa"] = _orthogonal(keys[5], (HIDDEN, 2 * HIDDEN), g).T        # (128, 64)
    p["ba"] = jnp.zeros((HIDDEN,), jnp.float32)
    p["wc"] = _orthogonal(keys[6], (1, 2 * HIDDEN), g).T             # (128, 1)
    p["bc"] = jnp.zeros((1,), jnp.float32)
    return p


# ----------------------------------------------------------------------------
# Host-side weight packing (done once). Matmul weights are stored as bf16.
# ----------------------------------------------------------------------------
PACKED_ORDER = ["wf1", "bf1", "w2", "b2", "w3", "b3",
                "whh", "bhh", "wht", "whb", "bhead"]


def pack_params(p):
    dset = np.asarray(DSET)
    H = HIDDEN

    # --- fuse layer-1 with the scattered GRU input-gate weights ---
    wih = np.asarray(p["wih"])                       # (192, 25)
    bih = np.asarray(p["bih"])                       # (192,)
    whh = np.asarray(p["whh"])                       # (192, 64)
    bhh = np.asarray(p["bhh"])                       # (192,)

    wih_scat = np.zeros((NUM_INPUTS, GATE_BLOCK), np.float32)
    bih_pad = np.zeros((GATE_BLOCK,), np.float32)
    whh_pad = np.zeros((H, GATE_BLOCK), np.float32)
    bhh_pad = np.zeros((GATE_BLOCK,), np.float32)
    for g in range(3):                               # gate order r, z, n
        lo = g * GATE_PAD
        wih_scat[dset, lo:lo + H] = wih[g * H:(g + 1) * H].T     # x[:, DSET] @ W_ih_g.T
        bih_pad[lo:lo + H] = bih[g * H:(g + 1) * H]
        whh_pad[:, lo:lo + H] = whh[g * H:(g + 1) * H].T
        bhh_pad[lo:lo + H] = bhh[g * H:(g + 1) * H]

    wf1 = np.concatenate([np.asarray(p["w1"]), wih_scat], axis=1)           # (73, 896)
    bf1 = np.concatenate([np.asarray(p["b1"]), bih_pad])[None, :]           # (1, 896)

    # --- fused lane-dense head: [actor | critic | pad | identity(h_new copy)] ---
    wa = np.asarray(p["wa"])                         # (128, 64)
    wc = np.asarray(p["wc"])                         # (128, 1)
    wht = np.zeros((H, HEAD_OUT), np.float32)        # multiplies h_new
    whb = np.zeros((H, HEAD_OUT), np.float32)        # multiplies fnn_out
    wht[:, ACTOR_OFF:ACTOR_OFF + H] = wa[:H]
    wht[:, CRITIC_OFF:CRITIC_OFF + 1] = wc[:H]
    wht[:, HXS_OFF:HXS_OFF + H] = np.eye(H, dtype=np.float32)
    whb[:, ACTOR_OFF:ACTOR_OFF + H] = wa[H:2 * H]
    whb[:, CRITIC_OFF:CRITIC_OFF + 1] = wc[H:2 * H]
    bhead = np.zeros((HEAD_OUT,), np.float32)
    bhead[ACTOR_OFF:ACTOR_OFF + H] = np.asarray(p["ba"])
    bhead[CRITIC_OFF] = float(np.asarray(p["bc"])[0])

    bf16 = jnp.bfloat16
    return {
        # matmul weights in bf16 (MXU would truncate to bf16 anyway); biases stay f32.
        "wf1": jnp.asarray(wf1, bf16), "bf1": jnp.asarray(bf1),
        "w2": jnp.asarray(p["w2"], bf16), "b2": jnp.asarray(p["b2"])[None, :],
        "w3": jnp.asarray(p["w3"], bf16), "b3": jnp.asarray(p["b3"])[None, :],
        "whh": jnp.asarray(whh_pad, bf16), "bhh": jnp.asarray(bhh_pad)[None, :],
        "wht": jnp.asarray(wht, bf16), "whb": jnp.asarray(whb, bf16),
        "bhead": jnp.asarray(bhead)[None, :],
    }


# ----------------------------------------------------------------------------
# Pallas kernel
# ----------------------------------------------------------------------------
def _warehouse_kernel(x_ref, hxs_ref, masks_ref,
                      wf1, bf1, w2, b2, w3, b3,
                      whh, bhh, wht, whb, bhead,
                      out_ref):
    f32 = jnp.float32
    bf16 = jnp.bfloat16
    x = x_ref[...].astype(bf16)

    # fused first matmul: lanes [0:512] = fnn layer-1 pre-act, [512:896] = GRU x-gates
    t1 = jnp.dot(x, wf1[...], preferred_element_type=f32) + bf1[...]
    h1 = jnp.maximum(t1[:, :FNN1], 0.0).astype(bf16)
    gx_r = t1[:, FNN1 + 0 * GATE_PAD: FNN1 + 0 * GATE_PAD + HIDDEN]
    gx_z = t1[:, FNN1 + 1 * GATE_PAD: FNN1 + 1 * GATE_PAD + HIDDEN]
    gx_n = t1[:, FNN1 + 2 * GATE_PAD: FNN1 + 2 * GATE_PAD + HIDDEN]

    # --- GRU branch first: consume the gate lanes of t1 before the fnn matmuls ---
    h = hxs_ref[...] * masks_ref[...]
    gh = jnp.dot(h.astype(bf16), whh[...], preferred_element_type=f32) + bhh[...]
    gh_r = gh[:, 0 * GATE_PAD: 0 * GATE_PAD + HIDDEN]
    gh_z = gh[:, 1 * GATE_PAD: 1 * GATE_PAD + HIDDEN]
    gh_n = gh[:, 2 * GATE_PAD: 2 * GATE_PAD + HIDDEN]

    r = jax.nn.sigmoid(gx_r + gh_r)
    z = jax.nn.sigmoid(gx_z + gh_z)
    n = jnp.tanh(gx_n + r * gh_n)
    h_new = (1.0 - z) * n + z * h

    # --- remaining fnn layers ---
    h2 = jnp.maximum(jnp.dot(h1, w2[...], preferred_element_type=f32) + b2[...],
                     0.0).astype(bf16)
    fnn_out = jnp.maximum(jnp.dot(h2, w3[...], preferred_element_type=f32) + b3[...],
                          0.0).astype(bf16)

    # fused lane-dense head: [actor | critic | pad | h_new], split-K avoids concat
    out_ref[...] = (jnp.dot(h_new.astype(bf16), wht[...], preferred_element_type=f32)
                    + jnp.dot(fnn_out, whb[...], preferred_element_type=f32)
                    + bhead[...])


# ----------------------------------------------------------------------------
# Wrapper
# ----------------------------------------------------------------------------
def _round_up(x, m):
    return ((x + m - 1) // m) * m


def _pick_tb(n):
    # Small batches: single tile (overhead/weight-DMA bound anyway).
    if n <= 16:
        return _round_up(max(n, 1), 8)
    # Aim for >=2 grid steps (megacore sharding on v7x) and cap the row tile at 256
    # so the per-tile f32 intermediates stay well inside scoped VMEM on every chip.
    return min(256, _round_up(-(-n // 2), 8))


@jax.jit
def warehouse_forward(inputs, rnn_hxs, masks, packed):
    n = inputs.shape[0]
    tb = _pick_tb(n)
    grid = -(-n // tb)                       # ragged last block is fine: row-independent

    weights = [packed[k] for k in PACKED_ORDER]
    bmap = lambda i: (i, 0)                  # batch-blocked operands
    wmap = lambda i: (0, 0)                  # weights: constant block -> stay resident

    in_specs = ([pl.BlockSpec((tb, NUM_INPUTS), bmap),
                 pl.BlockSpec((tb, HIDDEN), bmap),
                 pl.BlockSpec((tb, 1), bmap)]
                + [pl.BlockSpec(w.shape, wmap) for w in weights])

    out = pl.pallas_call(
        _warehouse_kernel,
        out_shape=jax.ShapeDtypeStruct((n, HEAD_OUT), jnp.float32),
        grid=(grid,),
        in_specs=in_specs,
        out_specs=pl.BlockSpec((tb, HEAD_OUT), bmap),
        compiler_params=pltpu.CompilerParams(dimension_semantics=("parallel",)),
    )(inputs, rnn_hxs, masks, *weights)

    hidden_critic = out[:, CRITIC_OFF:CRITIC_OFF + 1]
    hidden_actor = out[:, ACTOR_OFF:ACTOR_OFF + HIDDEN]
    new_hxs = out[:, HXS_OFF:HXS_OFF + HIDDEN]
    return hidden_critic, hidden_actor, new_hxs


# ----------------------------------------------------------------------------
# Pure-JAX reference (mirrors the PyTorch forward, raw f32 params) for correctness
# ----------------------------------------------------------------------------
def reference_forward(inputs, rnn_hxs, masks, p):
    H = HIDDEN
    x = inputs
    xr = x[:, np.asarray(DSET)]
    h = rnn_hxs * masks
    gi = xr @ p["wih"].T + p["bih"]
    gh = h @ p["whh"].T + p["bhh"]
    r = jax.nn.sigmoid(gi[:, :H] + gh[:, :H])
    z = jax.nn.sigmoid(gi[:, H:2 * H] + gh[:, H:2 * H])
    ncand = jnp.tanh(gi[:, 2 * H:] + r * gh[:, 2 * H:])
    h_new = (1.0 - z) * ncand + z * h
    h1 = jax.nn.relu(x @ p["w1"] + p["b1"])
    h2 = jax.nn.relu(h1 @ p["w2"] + p["b2"])
    fnn_out = jax.nn.relu(h2 @ p["w3"] + p["b3"])
    xcat = jnp.concatenate([h_new, fnn_out], axis=1)
    critic = xcat @ p["wc"] + p["bc"]
    actor = xcat @ p["wa"] + p["ba"]
    return critic, actor, h_new


if __name__ == "__main__":
    N = 8  # num_processes
    key = jax.random.PRNGKey(0)
    k_obs, k_hxs, k_mask = jax.random.split(key, 3)
    inputs = jax.random.normal(k_obs, (N, NUM_INPUTS), dtype=jnp.float32)
    rnn_hxs = jax.random.normal(k_hxs, (N, HIDDEN), dtype=jnp.float32)
    masks = (jax.random.uniform(k_mask, (N, 1)) > 0.3).astype(jnp.float32)

    raw = init_raw_params(seed=0)
    packed = pack_params(raw)

    critic, actor, hxs_out = warehouse_forward(inputs, rnn_hxs, masks, packed)
    jax.block_until_ready((critic, actor, hxs_out))

    rc, ra, rh = reference_forward(inputs, rnn_hxs, masks, raw)
    # bf16 weight storage (and the bf16 MXU path the reference also uses at default
    # precision) bounds errors around ~0.5% relative; tolerance relaxed accordingly.
    np.testing.assert_allclose(np.asarray(critic), np.asarray(rc), rtol=2e-2, atol=2e-2)
    np.testing.assert_allclose(np.asarray(actor), np.asarray(ra), rtol=2e-2, atol=2e-2)
    np.testing.assert_allclose(np.asarray(hxs_out), np.asarray(rh), rtol=2e-2, atol=2e-2)

    print("KERNEL_OK")
</pallas_src>

<mosaic_0001>
module attributes {stable_mosaic.version = 11 : i64} {
  func.func @_warehouse_kernel(%arg0: i32, %arg1: memref<8x73xf32, #tpu.memory_space<vmem>>, %arg2: memref<8x64xf32, #tpu.memory_space<vmem>>, %arg3: memref<8x1xf32, #tpu.memory_space<vmem>>, %arg4: memref<73x896xbf16, #tpu.memory_space<vmem>>, %arg5: memref<1x896xf32, #tpu.memory_space<vmem>>, %arg6: memref<512x256xbf16, #tpu.memory_space<vmem>>, %arg7: memref<1x256xf32, #tpu.memory_space<vmem>>, %arg8: memref<256x64xbf16, #tpu.memory_space<vmem>>, %arg9: memref<1x64xf32, #tpu.memory_space<vmem>>, %arg10: memref<64x384xbf16, #tpu.memory_space<vmem>>, %arg11: memref<1x384xf32, #tpu.memory_space<vmem>>, %arg12: memref<64x192xbf16, #tpu.memory_space<vmem>>, %arg13: memref<64x192xbf16, #tpu.memory_space<vmem>>, %arg14: memref<1x192xf32, #tpu.memory_space<vmem>>, %arg15: memref<8x192xf32, #tpu.memory_space<vmem>>) attributes {dimension_semantics = [#tpu.dimension_semantics<parallel>], iteration_bounds = array<i64: 1>, scalar_prefetch = 0 : i64, scratch_operands = 0 : i64, tpu.core_type = #tpu.core_type<tc>, window_params = [{transform_indices = @transform_0, window_bounds = array<i64: 8, 73>}, {transform_indices = @transform_1, window_bounds = array<i64: 8, 64>}, {transform_indices = @transform_2, window_bounds = array<i64: 8, 1>}, {pipeline_mode = #tpu.pipeline_mode<synchronous>, transform_indices = @transform_3, window_bounds = array<i64: 73, 896>}, {pipeline_mode = #tpu.pipeline_mode<synchronous>, transform_indices = @transform_4, window_bounds = array<i64: 1, 896>}, {pipeline_mode = #tpu.pipeline_mode<synchronous>, transform_indices = @transform_5, window_bounds = array<i64: 512, 256>}, {pipeline_mode = #tpu.pipeline_mode<synchronous>, transform_indices = @transform_6, window_bounds = array<i64: 1, 256>}, {pipeline_mode = #tpu.pipeline_mode<synchronous>, transform_indices = @transform_7, window_bounds = array<i64: 256, 64>}, {pipeline_mode = #tpu.pipeline_mode<synchronous>, transform_indices = @transform_8, window_bounds = array<i64: 1, 64>}, {pipeline_mode = #tpu.pipeline_mode<synchronous>, transform_indices = @transform_9, window_bounds = array<i64: 64, 384>}, {pipeline_mode = #tpu.pipeline_mode<synchronous>, transform_indices = @transform_10, window_bounds = array<i64: 1, 384>}, {pipeline_mode = #tpu.pipeline_mode<synchronous>, transform_indices = @transform_11, window_bounds = array<i64: 64, 192>}, {pipeline_mode = #tpu.pipeline_mode<synchronous>, transform_indices = @transform_12, window_bounds = array<i64: 64, 192>}, {pipeline_mode = #tpu.pipeline_mode<synchronous>, transform_indices = @transform_13, window_bounds = array<i64: 1, 192>}, {transform_indices = @transform_14, window_bounds = array<i64: 8, 192>}]} {
    %c0 = arith.constant 0 : index
    %c0_0 = arith.constant 0 : index
    %0 = vector.load %arg1[%c0, %c0_0] : memref<8x73xf32, #tpu.memory_space<vmem>>, vector<8x73xf32>
    %1 = arith.truncf %0 : vector<8x73xf32> to vector<8x73xbf16>
    %c0_1 = arith.constant 0 : index
    %c0_2 = arith.constant 0 : index
    %2 = vector.load %arg4[%c0_1, %c0_2] : memref<73x896xbf16, #tpu.memory_space<vmem>>, vector<73x896xbf16>
    %cst = arith.constant dense<0.000000e+00> : vector<8x896xf32>
    %3 = tpu.matmul %1, %2, %cst {dimension_numbers = #tpu.dot_dimension_numbers<[1], [0], [0], [1], [0, 0, 1, 1], [], []>} : vector<8x73xbf16>, vector<73x896xbf16>, vector<8x896xf32> -> vector<8x896xf32>
    %c0_3 = arith.constant 0 : index
    %c0_4 = arith.constant 0 : index
    %4 = vector.load %arg5[%c0_3, %c0_4] : memref<1x896xf32, #tpu.memory_space<vmem>>, vector<1x896xf32>
    %5 = vector.broadcast %4 : vector<1x896xf32> to vector<8x896xf32>
    %6 = arith.addf %3, %5 : vector<8x896xf32>
    %7 = vector.extract_strided_slice %6 {offsets = [0, 0], sizes = [8, 512], strides = [1, 1]} : vector<8x896xf32> to vector<8x512xf32>
    %cst_5 = arith.constant 0.000000e+00 : f32
    %8 = vector.broadcast %cst_5 : f32 to vector<8x512xf32>
    %9 = arith.maximumf %7, %8 : vector<8x512xf32>
    %10 = arith.truncf %9 : vector<8x512xf32> to vector<8x512xbf16>
    %11 = vector.extract_strided_slice %6 {offsets = [0, 512], sizes = [8, 64], strides = [1, 1]} : vector<8x896xf32> to vector<8x64xf32>
    %12 = vector.extract_strided_slice %6 {offsets = [0, 640], sizes = [8, 64], strides = [1, 1]} : vector<8x896xf32> to vector<8x64xf32>
    %13 = vector.extract_strided_slice %6 {offsets = [0, 768], sizes = [8, 64], strides = [1, 1]} : vector<8x896xf32> to vector<8x64xf32>
    %c0_6 = arith.constant 0 : index
    %c0_7 = arith.constant 0 : index
    %14 = vector.load %arg2[%c0_6, %c0_7] : memref<8x64xf32, #tpu.memory_space<vmem>>, vector<8x64xf32>
    %c0_8 = arith.constant 0 : index
    %c0_9 = arith.constant 0 : index
    %15 = vector.load %arg3[%c0_8, %c0_9] : memref<8x1xf32, #tpu.memory_space<vmem>>, vector<8x1xf32>
    %16 = vector.broadcast %15 : vector<8x1xf32> to vector<8x64xf32>
    %17 = arith.mulf %14, %16 : vector<8x64xf32>
    %18 = arith.truncf %17 : vector<8x64xf32> to vector<8x64xbf16>
    %c0_10 = arith.constant 0 : index
    %c0_11 = arith.constant 0 : index
    %19 = vector.load %arg10[%c0_10, %c0_11] : memref<64x384xbf16, #tpu.memory_space<vmem>>, vector<64x384xbf16>
    %cst_12 = arith.constant dense<0.000000e+00> : vector<8x384xf32>
    %20 = tpu.matmul %18, %19, %cst_12 {dimension_numbers = #tpu.dot_dimension_numbers<[1], [0], [0], [1], [0, 0, 1, 1], [], []>} : vector<8x64xbf16>, vector<64x384xbf16>, vector<8x384xf32> -> vector<8x384xf32>
    %c0_13 = arith.constant 0 : index
    %c0_14 = arith.constant 0 : index
    %21 = vector.load %arg11[%c0_13, %c0_14] : memref<1x384xf32, #tpu.memory_space<vmem>>, vector<1x384xf32>
    %22 = vector.broadcast %21 : vector<1x384xf32> to vector<8x384xf32>
    %23 = arith.addf %20, %22 : vector<8x384xf32>
    %24 = vector.extract_strided_slice %23 {offsets = [0, 0], sizes = [8, 64], strides = [1, 1]} : vector<8x384xf32> to vector<8x64xf32>
    %25 = vector.extract_strided_slice %23 {offsets = [0, 128], sizes = [8, 64], strides = [1, 1]} : vector<8x384xf32> to vector<8x64xf32>
    %26 = vector.extract_strided_slice %23 {offsets = [0, 256], sizes = [8, 64], strides = [1, 1]} : vector<8x384xf32> to vector<8x64xf32>
    %27 = arith.addf %11, %24 : vector<8x64xf32>
    %28 = arith.negf %27 : vector<8x64xf32>
    %29 = math.exp %28 : vector<8x64xf32>
    %cst_15 = arith.constant 1.000000e+00 : f32
    %30 = vector.broadcast %cst_15 : f32 to vector<8x64xf32>
    %31 = arith.addf %30, %29 : vector<8x64xf32>
    %32 = arith.divf %30, %31 : vector<8x64xf32>
    %33 = arith.addf %12, %25 : vector<8x64xf32>
    %34 = arith.negf %33 : vector<8x64xf32>
    %35 = math.exp %34 : vector<8x64xf32>
    %cst_16 = arith.constant 1.000000e+00 : f32
    %36 = vector.broadcast %cst_16 : f32 to vector<8x64xf32>
    %37 = arith.addf %36, %35 : vector<8x64xf32>
    %38 = arith.divf %36, %37 : vector<8x64xf32>
    %39 = arith.mulf %32, %26 : vector<8x64xf32>
    %40 = arith.addf %13, %39 : vector<8x64xf32>
    %41 = math.tanh %40 : vector<8x64xf32>
    %cst_17 = arith.constant 1.000000e+00 : f32
    %42 = vector.broadcast %cst_17 : f32 to vector<8x64xf32>
    %43 = arith.subf %42, %38 : vector<8x64xf32>
    %44 = arith.mulf %43, %41 : vector<8x64xf32>
    %45 = arith.mulf %38, %17 : vector<8x64xf32>
    %46 = arith.addf %44, %45 : vector<8x64xf32>
    %c0_18 = arith.constant 0 : index
    %c0_19 = arith.constant 0 : index
    %47 = vector.load %arg6[%c0_18, %c0_19] : memref<512x256xbf16, #tpu.memory_space<vmem>>, vector<512x256xbf16>
    %cst_20 = arith.constant dense<0.000000e+00> : vector<8x256xf32>
    %48 = tpu.matmul %10, %47, %cst_20 {dimension_numbers = #tpu.dot_dimension_numbers<[1], [0], [0], [1], [0, 0, 1, 1], [], []>} : vector<8x512xbf16>, vector<512x256xbf16>, vector<8x256xf32> -> vector<8x256xf32>
    %c0_21 = arith.constant 0 : index
    %c0_22 = arith.constant 0 : index
    %49 = vector.load %arg7[%c0_21, %c0_22] : memref<1x256xf32, #tpu.memory_space<vmem>>, vector<1x256xf32>
    %50 = vector.broadcast %49 : vector<1x256xf32> to vector<8x256xf32>
    %51 = arith.addf %48, %50 : vector<8x256xf32>
    %cst_23 = arith.constant 0.000000e+00 : f32
    %52 = vector.broadcast %cst_23 : f32 to vector<8x256xf32>
    %53 = arith.maximumf %51, %52 : vector<8x256xf32>
    %54 = arith.truncf %53 : vector<8x256xf32> to vector<8x256xbf16>
    %c0_24 = arith.constant 0 : index
    %c0_25 = arith.constant 0 : index
    %55 = vector.load %arg8[%c0_24, %c0_25] : memref<256x64xbf16, #tpu.memory_space<vmem>>, vector<256x64xbf16>
    %cst_26 = arith.constant dense<0.000000e+00> : vector<8x64xf32>
    %56 = tpu.matmul %54, %55, %cst_26 {dimension_numbers = #tpu.dot_dimension_numbers<[1], [0], [0], [1], [0, 0, 1, 1], [], []>} : vector<8x256xbf16>, vector<256x64xbf16>, vector<8x64xf32> -> vector<8x64xf32>
    %c0_27 = arith.constant 0 : index
    %c0_28 = arith.constant 0 : index
    %57 = vector.load %arg9[%c0_27, %c0_28] : memref<1x64xf32, #tpu.memory_space<vmem>>, vector<1x64xf32>
    %58 = vector.broadcast %57 : vector<1x64xf32> to vector<8x64xf32>
    %59 = arith.addf %56, %58 : vector<8x64xf32>
    %cst_29 = arith.constant 0.000000e+00 : f32
    %60 = vector.broadcast %cst_29 : f32 to vector<8x64xf32>
    %61 = arith.maximumf %59, %60 : vector<8x64xf32>
    %62 = arith.truncf %61 : vector<8x64xf32> to vector<8x64xbf16>
    %63 = arith.truncf %46 : vector<8x64xf32> to vector<8x64xbf16>
    %c0_30 = arith.constant 0 : index
    %c0_31 = arith.constant 0 : index
    %64 = vector.load %arg12[%c0_30, %c0_31] : memref<64x192xbf16, #tpu.memory_space<vmem>>, vector<64x192xbf16>
    %cst_32 = arith.constant dense<0.000000e+00> : vector<8x192xf32>
    %65 = tpu.matmul %63, %64, %cst_32 {dimension_numbers = #tpu.dot_dimension_numbers<[1], [0], [0], [1], [0, 0, 1, 1], [], []>} : vector<8x64xbf16>, vector<64x192xbf16>, vector<8x192xf32> -> vector<8x192xf32>
    %c0_33 = arith.constant 0 : index
    %c0_34 = arith.constant 0 : index
    %66 = vector.load %arg13[%c0_33, %c0_34] : memref<64x192xbf16, #tpu.memory_space<vmem>>, vector<64x192xbf16>
    %cst_35 = arith.constant dense<0.000000e+00> : vector<8x192xf32>
    %67 = tpu.matmul %62, %66, %cst_35 {dimension_numbers = #tpu.dot_dimension_numbers<[1], [0], [0], [1], [0, 0, 1, 1], [], []>} : vector<8x64xbf16>, vector<64x192xbf16>, vector<8x192xf32> -> vector<8x192xf32>
    %68 = arith.addf %65, %67 : vector<8x192xf32>
    %c0_36 = arith.constant 0 : index
    %c0_37 = arith.constant 0 : index
    %69 = vector.load %arg14[%c0_36, %c0_37] : memref<1x192xf32, #tpu.memory_space<vmem>>, vector<1x192xf32>
    %70 = vector.broadcast %69 : vector<1x192xf32> to vector<8x192xf32>
    %71 = arith.addf %68, %70 : vector<8x192xf32>
    %c0_38 = arith.constant 0 : index
    %c0_39 = arith.constant 0 : index
    %72 = vector.load %arg15[%c0_38, %c0_39] : memref<8x192xf32, #tpu.memory_space<vmem>>, vector<8x192xf32>
    tpu.vector_store %arg15[%c0_38, %c0_39], %71 {strides = array<i32>} : memref<8x192xf32, #tpu.memory_space<vmem>>, vector<8x192xf32>,
    return
  }
  func.func @transform_0(%arg0: i32) -> (i32, i32) {
    %c0_i32 = arith.constant 0 : i32
    %c0_i32_0 = arith.constant 0 : i32
    return %arg0, %c0_i32 : i32, i32
  }
  func.func @transform_1(%arg0: i32) -> (i32, i32) {
    %c0_i32 = arith.constant 0 : i32
    %c0_i32_0 = arith.constant 0 : i32
    return %arg0, %c0_i32 : i32, i32
  }
  func.func @transform_2(%arg0: i32) -> (i32, i32) {
    %c0_i32 = arith.constant 0 : i32
    %c0_i32_0 = arith.constant 0 : i32
    return %arg0, %c0_i32 : i32, i32
  }
  func.func @transform_3(%arg0: i32) -> (i32, i32) {
    %c0_i32 = arith.constant 0 : i32
    %c0_i32_0 = arith.constant 0 : i32
    %c0_i32_1 = arith.constant 0 : i32
    return %c0_i32, %c0_i32_0 : i32, i32
  }
  func.func @transform_4(%arg0: i32) -> (i32, i32) {
    %c0_i32 = arith.constant 0 : i32
    %c0_i32_0 = arith.constant 0 : i32
    %c0_i32_1 = arith.constant 0 : i32
    return %c0_i32, %c0_i32_0 : i32, i32
  }
  func.func @transform_5(%arg0: i32) -> (i32, i32) {
    %c0_i32 = arith.constant 0 : i32
    %c0_i32_0 = arith.constant 0 : i32
    %c0_i32_1 = arith.constant 0 : i32
    return %c0_i32, %c0_i32_0 : i32, i32
  }
  func.func @transform_6(%arg0: i32) -> (i32, i32) {
    %c0_i32 = arith.constant 0 : i32
    %c0_i32_0 = arith.constant 0 : i32
    %c0_i32_1 = arith.constant 0 : i32
    return %c0_i32, %c0_i32_0 : i32, i32
  }
  func.func @transform_7(%arg0: i32) -> (i32, i32) {
    %c0_i32 = arith.constant 0 : i32
    %c0_i32_0 = arith.constant 0 : i32
    %c0_i32_1 = arith.constant 0 : i32
    return %c0_i32, %c0_i32_0 : i32, i32
  }
  func.func @transform_8(%arg0: i32) -> (i32, i32) {
    %c0_i32 = arith.constant 0 : i32
    %c0_i32_0 = arith.constant 0 : i32
    %c0_i32_1 = arith.constant 0 : i32
    return %c0_i32, %c0_i32_0 : i32, i32
  }
  func.func @transform_9(%arg0: i32) -> (i32, i32) {
    %c0_i32 = arith.constant 0 : i32
    %c0_i32_0 = arith.constant 0 : i32
    %c0_i32_1 = arith.constant 0 : i32
    return %c0_i32, %c0_i32_0 : i32, i32
  }
  func.func @transform_10(%arg0: i32) -> (i32, i32) {
    %c0_i32 = arith.constant 0 : i32
    %c0_i32_0 = arith.constant 0 : i32
    %c0_i32_1 = arith.constant 0 : i32
    return %c0_i32, %c0_i32_0 : i32, i32
  }
  func.func @transform_11(%arg0: i32) -> (i32, i32) {
    %c0_i32 = arith.constant 0 : i32
    %c0_i32_0 = arith.constant 0 : i32
    %c0_i32_1 = arith.constant 0 : i32
    return %c0_i32, %c0_i32_0 : i32, i32
  }
  func.func @transform_12(%arg0: i32) -> (i32, i32) {
    %c0_i32 = arith.constant 0 : i32
    %c0_i32_0 = arith.constant 0 : i32
    %c0_i32_1 = arith.constant 0 : i32
    return %c0_i32, %c0_i32_0 : i32, i32
  }
  func.func @transform_13(%arg0: i32) -> (i32, i32) {
    %c0_i32 = arith.constant 0 : i32
    %c0_i32_0 = arith.constant 0 : i32
    %c0_i32_1 = arith.constant 0 : i32
    return %c0_i32, %c0_i32_0 : i32, i32
  }
  func.func @transform_14(%arg0: i32) -> (i32, i32) {
    %c0_i32 = arith.constant 0 : i32
    %c0_i32_0 = arith.constant 0 : i32
    return %arg0, %c0_i32 : i32, i32
  }
}

</mosaic_0001>

<bundles_post_ra>
// kernel: warehouse_forward.1
= control target key start
LH: loop header
LB: loop body
LE: loop exit
PB: predicated region body
PF: predicated region fallthrough
CT: control target
= control target key end

     0   :  { %19 = vsyncpa [#allocation3], 0  ;;  %s2740_s0 = inlined_call_operand.hbm [shape: f32[8,73], index: 0, kind: input, shape index: {}]   ;;  %s2741_s1 = inlined_call_operand.hbm [shape: f32[8,64], index: 1, kind: input, shape index: {}]   ;;  %s2742_s2 = inlined_call_operand.vmem [shape: f32[8,1], index: 2, kind: input, shape index: {}]   ;;  %s2743_s3 = inlined_call_operand.hbm [shape: bf16[73,896], index: 3, kind: input, shape index: {}]   ;;  %s2744_s4 = inlined_call_operand.hbm [shape: f32[1,896], index: 4, kind: input, shape index: {}]   ;;  %s2745_s5 = inlined_call_operand.hbm [shape: bf16[512,256], index: 5, kind: input, shape index: {}]   ;;  %s2746_s6 = inlined_call_operand.hbm [shape: f32[1,256], index: 6, kind: input, shape index: {}]   ;;  %s2747_s7 = inlined_call_operand.vmem [shape: bf16[256,64], index: 7, kind: input, shape index: {}]   ;;  %s2748_s8 = inlined_call_operand.hbm [shape: f32[1,64], index: 8, kind: input, shape index: {}]   ;;  %s2749_s9 = inlined_call_operand.vmem [shape: bf16[64,384], index: 9, kind: input, shape index: {}]   ;;  %s2750_s10 = inlined_call_operand.vmem [shape: f32[1,384], index: 10, kind: input, shape index: {}]   ;;  %s2751_s11 = inlined_call_operand.vmem [shape: bf16[64,192], index: 11, kind: input, shape index: {}]   ;;  %s2752_s12 = inlined_call_operand.vmem [shape: bf16[64,192], index: 12, kind: input, shape index: {}]   ;;  %s2753_s13 = inlined_call_operand.hbm [shape: f32[1,192], index: 13, kind: input, shape index: {}]   ;;  %s2754_s14 = inlined_call_operand.vmem [shape: f32[8,192], index: 14, kind: output, shape index: {}]  }
   0x1   :  { %20 = vsyncpa [#allocation5], 0 }
   0x2   :  { %21 = vsyncpa [#allocation8], 0 }
   0x3   :  { %22 = vsyncpa [#allocation11], 0 }
   0x4   :  { %23 = vsyncpa [#allocation14], 0  ;;  %s2318_s29 = smov [#allocation4]   ;;  %s2319_s15 = smov [#allocation7]  }
   0x5   :  { %s40_s30 = sshll.u32 %s2318_s29, 4  ;;  %s64_s16 = sshll.u32 %s2319_s15, 4  ;;  %s41_s30 = int_to_ptr.vmem [resolvable:$true] %s40_s30  ;;  %s65_s16 = int_to_ptr.vmem [resolvable:$true] %s64_s16 }
   0x6   :  { %s2132_s19 = scalar_lea.hbm %s2741_s1, 128 }
   0x7   :  { %p2133_p0 = scmp.ne.s32.totalorder %s2741_s1, %s2132_s19  ;;  %p2136_p1 = scmp.lt.u32.totalorder %s2132_s19, %s2741_s1 }
   0x9   :  { %p2138_p2 = pnand %p2136_p1, %p2133_p0 }
   0xb   :  { %2141 = shalt.err (!%p2138_p2)
}
   0xc   :  { %s2142_s24 = scalar_lea.vmem %s41_s30, 128  ;;  %p2147_p4 = scmp.lt.s32.totalorder %s41_s30, %s41_s30 }
   0xd   :  { %p2143_p3 = scmp.ne.s32.totalorder %s41_s30, %s2142_s24  ;;  %p2148_p5 = scmp.lt.s32.totalorder %s2142_s24, %s2142_s24 }
   0xf   :  { %p2149_p6 = por %p2148_p5, %p2147_p4 }
  0x11   :  { %p2150_p7 = pnand %p2149_p6, %p2143_p3 }
  0x13   :  { %2153 = shalt.err (!%p2150_p7)
}
  0x14   :  { %43 = dma.hbm_to_vmem [thread:$0]  %s2741_s1, 128, %s41_s30, [#allocation5]  }
  0x15   :  { %s2154_s29 = scalar_lea.hbm %s2744_s4, 112 }
  0x16   :  { %p2155_p8 = scmp.ne.s32.totalorder %s2744_s4, %s2154_s29  ;;  %p2158_p9 = scmp.lt.u32.totalorder %s2154_s29, %s2744_s4 }
  0x18   :  { %p2160_p10 = pnand %p2158_p9, %p2155_p8 }
  0x1a   :  { %2163 = shalt.err (!%p2160_p10)
}
  0x1b   :  { %s2164_s20 = scalar_lea.vmem %s65_s16, 112  ;;  %s2168_s21 = scalar_lea.vmem %s65_s16, 128 }
  0x1c   :  { %p2165_p11 = scmp.ne.s32.totalorder %s65_s16, %s2164_s20  ;;  %p2169_p12 = scmp.lt.s32.totalorder %s65_s16, %s65_s16 }
  0x1d   :  { %p2170_p13 = scmp.lt.s32.totalorder %s2168_s21, %s2164_s20 }
  0x1f   :  { %p2171_p0 = por %p2170_p13, %p2169_p12 }
  0x21   :  { %p2172_p1 = pnand %p2171_p0, %p2165_p11 }
  0x23   :  { %2175 = shalt.err (!%p2172_p1)
}
  0x24   :  { %67 = dma.hbm_to_vmem [thread:$0]  %s2744_s4, 112, %s65_s16, [#allocation8]  }
  0x25   :  { %s2320_s22 = smov [#allocation10]   ;;  %s2321_s24 = smov [#allocation2]  }
  0x26   :  { %s86_s23 = sshll.u32 %s2320_s22, 4  ;;  %s30_s25 = sshll.u32 %s2321_s24, 4  ;;  %s87_s23 = int_to_ptr.vmem [resolvable:$true] %s86_s23  ;;  %s31_s25 = int_to_ptr.vmem [resolvable:$true] %s30_s25 }
  0x27   :  { %s2176_s28 = scalar_lea.hbm %s2746_s6, 32 }
  0x28   :  { %p2177_p2 = scmp.ne.s32.totalorder %s2746_s6, %s2176_s28  ;;  %p2180_p3 = scmp.lt.u32.totalorder %s2176_s28, %s2746_s6 }
  0x2a   :  { %p2182_p4 = pnand %p2180_p3, %p2177_p2 }
  0x2c   :  { %2185 = shalt.err (!%p2182_p4)
}
  0x2d   :  { %s2186_s4 = scalar_lea.vmem %s87_s23, 32  ;;  %p2191_p6 = scmp.lt.s32.totalorder %s87_s23, %s87_s23 }
  0x2e   :  { %p2187_p5 = scmp.ne.s32.totalorder %s87_s23, %s2186_s4  ;;  %p2192_p7 = scmp.lt.s32.totalorder %s2186_s4, %s2186_s4 }
  0x30   :  { %p2193_p8 = por %p2192_p7, %p2191_p6 }
  0x32   :  { %p2194_p9 = pnand %p2193_p8, %p2187_p5 }
  0x34   :  { %2197 = shalt.err (!%p2194_p9)
}
  0x35   :  { %89 = dma.hbm_to_vmem [thread:$0]  %s2746_s6, 32, %s87_s23, [#allocation11]  }
  0x36   :  { %s2198_s1 = scalar_lea.hbm %s2740_s0, 128 }
  0x37   :  { %p2199_p10 = scmp.ne.s32.totalorder %s2740_s0, %s2198_s1  ;;  %p2202_p11 = scmp.lt.u32.totalorder %s2198_s1, %s2740_s0 }
  0x39   :  { %p2204_p12 = pnand %p2202_p11, %p2199_p10 }
  0x3b   :  { %2207 = shalt.err (!%p2204_p12)
}
  0x3c   :  { %s2208_s27 = scalar_lea.vmem %s31_s25, 128  ;;  %p2213_p0 = scmp.lt.s32.totalorder %s31_s25, %s31_s25 }
  0x3d   :  { %p2209_p13 = scmp.ne.s32.totalorder %s31_s25, %s2208_s27  ;;  %p2214_p1 = scmp.lt.s32.totalorder %s2208_s27, %s2208_s27 }
  0x3f   :  { %p2215_p2 = por %p2214_p1, %p2213_p0 }
  0x41   :  { %p2216_p3 = pnand %p2215_p2, %p2209_p13 }
  0x43   :  { %2219 = shalt.err (!%p2216_p3)
}
  0x44   :  { %33 = dma.hbm_to_vmem [thread:$0]  %s2740_s0, 128, %s31_s25, [#allocation3]  }
  0x45   :  { %s2322_s28 = smov [#allocation6]   ;;  %s2220_s18 = scalar_lea.hbm %s2743_s3, 4480 }
  0x46   :  { %s51_s29 = sshll.u32 %s2322_s28, 4  ;;  %p2221_p4 = scmp.ne.s32.totalorder %s2743_s3, %s2220_s18  ;;  %s52_s29 = int_to_ptr.vmem [resolvable:$true] %s51_s29 }
  0x47   :  { %p2224_p5 = scmp.lt.u32.totalorder %s2220_s18, %s2743_s3 }
  0x49   :  { %p2226_p6 = pnand %p2224_p5, %p2221_p4 }
  0x4b   :  { %2229 = shalt.err (!%p2226_p6)
}
  0x4c   :  { %s2230_s21 = scalar_lea.vmem %s52_s29, 4480  ;;  %p2235_p8 = scmp.lt.s32.totalorder %s52_s29, %s52_s29 }
  0x4d   :  { %p2231_p7 = scmp.ne.s32.totalorder %s52_s29, %s2230_s21  ;;  %p2236_p9 = scmp.lt.s32.totalorder %s2230_s21, %s2230_s21 }
  0x4f   :  { %p2237_p10 = por %p2236_p9, %p2235_p8 }
  0x51   :  { %p2238_p11 = pnand %p2237_p10, %p2231_p7 }
  0x53   :  { %2241 = shalt.err (!%p2238_p11)
}
  0x54   :  { %s2323_s0 = smov 448   ;;  %s2324_s25 = smov 28  }
  0x55   :  { %57 = dma.hbm_to_vmem [thread:$0]  %s2743_s3, 4480, %s52_s29, [#allocation5], %s2323_s0, %s2323_s0, %s2324_s25  }
  0x56   :  { %s2325_s22 = smov [#allocation9]   ;;  %s2242_s6 = scalar_lea.hbm %s2745_s5, 8192 }
  0x57   :  { %s73_s24 = sshll.u32 %s2325_s22, 4  ;;  %p2243_p12 = scmp.ne.s32.totalorder %s2745_s5, %s2242_s6  ;;  %s74_s24 = int_to_ptr.vmem [resolvable:$true] %s73_s24 }
  0x58   :  { %p2246_p13 = scmp.lt.u32.totalorder %s2242_s6, %s2745_s5 }
  0x5a   :  { %p2248_p0 = pnand %p2246_p13, %p2243_p12 }
  0x5c   :  { %2251 = shalt.err (!%p2248_p0)
}
  0x5d   :  { %s2252_s18 = scalar_lea.vmem %s74_s24, 8192  ;;  %p2257_p2 = scmp.lt.s32.totalorder %s74_s24, %s74_s24 }
  0x5e   :  { %p2253_p1 = scmp.ne.s32.totalorder %s74_s24, %s2252_s18  ;;  %p2258_p3 = scmp.lt.s32.totalorder %s2252_s18, %s2252_s18 }
  0x60   :  { %p2259_p4 = por %p2258_p3, %p2257_p2 }
  0x62   :  { %p2260_p5 = pnand %p2259_p4, %p2253_p1 }
  0x64   :  { %2263 = shalt.err (!%p2260_p5)
}
  0x65   :  { %s2326_s3 = smov 128   ;;  %s2327_s29 = smov 8  }
  0x66   :  { %79 = dma.hbm_to_vmem [thread:$0]  %s2745_s5, 8192, %s74_s24, [#allocation8], %s2326_s3, %s2326_s3, %s2327_s29  }
  0x67   :  { %s2328_s19 = smov [#allocation12]   ;;  %s2329_s21 = smov [#allocation13]  }
  0x68   :  { %s98_s20 = sshll.u32 %s2328_s19, 4  ;;  %s116_s0 = sshll.u32 %s2329_s21, 4  ;;  %s99_s20 = int_to_ptr.vmem [resolvable:$true] %s98_s20  ;;  %s117_s0 = int_to_ptr.vmem [resolvable:$true] %s116_s0 }
  0x69   :  { %s2264_s30 = scalar_lea.hbm %s2748_s8, 16 }
  0x6a   :  { %p2265_p6 = scmp.ne.s32.totalorder %s2748_s8, %s2264_s30  ;;  %p2268_p7 = scmp.lt.u32.totalorder %s2264_s30, %s2748_s8 }
  0x6c   :  { %p2270_p8 = pnand %p2268_p7, %p2265_p6 }
  0x6e   :  { %2273 = shalt.err (!%p2270_p8)
}
  0x6f   :  { %s2274_s5 = scalar_lea.vmem %s99_s20, 16  ;;  %s2278_s24 = scalar_lea.vmem %s99_s20, 32 }
  0x70   :  { %p2275_p9 = scmp.ne.s32.totalorder %s99_s20, %s2274_s5  ;;  %p2279_p10 = scmp.lt.s32.totalorder %s99_s20, %s99_s20 }
  0x71   :  { %p2280_p11 = scmp.lt.s32.totalorder %s2278_s24, %s2274_s5 }
  0x73   :  { %p2281_p12 = por %p2280_p11, %p2279_p10 }
  0x75   :  { %p2282_p13 = pnand %p2281_p12, %p2275_p9 }
  0x77   :  { %2285 = shalt.err (!%p2282_p13)
}
  0x78   :  { %101 = dma.hbm_to_vmem [thread:$0]  %s2748_s8, 16, %s99_s20, [#allocation11]  }
  0x79   :  { %s2286_s18 = scalar_lea.hbm %s2753_s13, 32 }
  0x7a   :  { %p2287_p0 = scmp.ne.s32.totalorder %s2753_s13, %s2286_s18  ;;  %p2290_p1 = scmp.lt.u32.totalorder %s2286_s18, %s2753_s13 }
  0x7c   :  { %p2292_p2 = pnand %p2290_p1, %p2287_p0 }
  0x7e   :  { %2295 = shalt.err (!%p2292_p2)
}
  0x7f   :  { %s2296_s19 = scalar_lea.vmem %s117_s0, 32  ;;  %p2301_p4 = scmp.lt.s32.totalorder %s117_s0, %s117_s0 }
  0x80   :  { %p2297_p3 = scmp.ne.s32.totalorder %s117_s0, %s2296_s19  ;;  %p2302_p5 = scmp.lt.s32.totalorder %s2296_s19, %s2296_s19 }
  0x82   :  { %p2303_p6 = por %p2302_p5, %p2301_p4 }
  0x84   :  { %p2304_p7 = pnand %p2303_p6, %p2297_p3 }
  0x86   :  { %2307 = shalt.err (!%p2304_p7)
}
  0x87   :  { %119 = dma.hbm_to_vmem [thread:$0]  %s2753_s13, 32, %s117_s0, [#allocation14]  }
  0x88   :  { %2308 = dma.done.wait [#allocation3], 128  }
  0x89   :  { %2309 = vsyncadd [#allocation3], 4294967168 }
  0x8a   :  { %2310 = dma.done.wait [#allocation5], 4608  }
  0x8b   :  { %2311 = vsyncadd [#allocation5], 4294962688 }
  0x8c   :  { %2312 = dma.done.wait [#allocation8], 8304  }
  0x8d   :  { %2313 = vsyncadd [#allocation8], 4294958992 }
  0x8e   :  { %2314 = dma.done.wait [#allocation11], 48  }
  0x8f   :  { %2315 = vsyncadd [#allocation11], 4294967248 }
  0x90   :  { %2316 = dma.done.wait [#allocation14], 32  }
  0x91   :  { %2317 = vsyncadd [#allocation14], 4294967264  ;;  %v2330_v0 = vmov 0   ;;  %v1920_v1 = vld [vmem:[#allocation6 + $0x4] ss:$28 sps:$4 sm:$0xff]   ;;  %vm401_vm0 = vcmask 1043456  }
  0x92   :  { %458 = vmatprep.mubr.bf16.mxu1 %v2330_v0  ;;  %1919 = vset.pattern.permute.xlu0 %v2330_v0  ;;  %v1922_v2 = vld [vmem:[#allocation6] ss:$28 sps:$4 sm:$0xff]   ;;  %v1925_v4 = vld [vmem:[#allocation6 + $0x38] ss:$28 sps:$4 sm:$0xff]   ;;  %vm402_vm1 = vcmask 1044480   ;;  %v2331_v6 = vmov 65535  }
  0x93   :  { %540 = vmatprep.mubr.bf16.mxu0 %v2330_v0  ;;  %426 = vmatprep.subr.bf16.mxu1 %v1920_v1  ;;  %v1923_v3 = vld [vmem:[#allocation6 + $0x3c] ss:$28 sps:$4 sm:$0xff]   ;;  %v1926_v5 = vld [vmem:[#allocation6 + $0x74] ss:$28 sps:$4 sm:$0xff]   ;;  %v403_v7 = vsel %vm401_vm0, 4294967295, %v2331_v6  ;;  %vm397_vm2 = vcmask 596992  }
  0x94   :  { %427 = vmatpush1.bf16.msra.mxu1 %v1922_v2  ;;  %v1928_v8 = vld [vmem:[#allocation6 + $0x70] ss:$28 sps:$4 sm:$0xff]   ;;  %v1932_v11 = vld [vmem:[#allocation6 + $0xe4] ss:$28 sps:$4 sm:$0x1f]   ;;  %v2511_v12 = vsel %vm402_vm1, %v403_v7, 0 }
  0x95   :  { %428 = vmatprep.subr.bf16.mxu1 %v1923_v3  ;;  %v598_v9 = vld [vmem:[%s2742_s2] sm:$0xff]  ;;  %v1929_v10 = vld [vmem:[#allocation6 + $0xac] ss:$28 sps:$4 sm:$0xff]   ;;  %v1934_v14 = vld [vmem:[#allocation6 + $0xe0] ss:$28 sps:$4 sm:$0x1f]   ;;  %v409_v15 = vand.u32 %v1932_v11, %v2511_v12 }
  0x96   :  { %601 = vperm.xlu0 %1919, %v598_v9   ;;  %v1931_v13 = vld [vmem:[#allocation6 + $0xa8] ss:$28 sps:$4 sm:$0xff]   ;;  %v406_v16 = vand.u32 %v1934_v14, %v2511_v12  ;;  %v145_v17 = vld [vmem:[#allocation2] sm:$0xff]  ;;  %v1938_v27 = vld [vmem:[#allocation6 + $0x40] ss:$28 sps:$4 sm:$0xff]   ;;  %v2332_v47 = vmov 0.0  }
  0x97   :  { %v1937_v18 = vld [vmem:[#allocation6 + $0xc] ss:$28 sps:$4 sm:$0xff]   ;;  %v2515_v20 = vpack.c.bf16 %v145_v17, %v145_v17  ;;  %v1953_v21 = vld [vmem:[#allocation6 + $0x14] ss:$28 sps:$4 sm:$0xff]   ;;  %v1940_v23 = vld [vmem:[#allocation6 + $0x44] ss:$28 sps:$4 sm:$0xff]  }
  0x98   :  { %429 = vmatpush1.bf16.msra.mxu1 %v1925_v4  ;;  %v1935_v19 = vld [vmem:[#allocation6 + $0x8] ss:$28 sps:$4 sm:$0xff]   ;;  %v1955_v22 = vld [vmem:[#allocation6 + $0x10] ss:$28 sps:$4 sm:$0xff]   ;;  %508 = vmatprep.subr.bf16.mxu0 %v1953_v21  ;;  %v1943_v28 = vld [vmem:[#allocation6 + $0x7c] ss:$28 sps:$4 sm:$0xff]  }
  0x99   :  { %430 = vmatprep.subr.bf16.mxu1 %v1926_v5  ;;  %v1957_v24 = vld [vmem:[#allocation6 + $0x4c] ss:$28 sps:$4 sm:$0xff]   ;;  %509 = vmatpush1.bf16.msra.mxu0 %v1955_v22  ;;  %v1961_v26 = vld [vmem:[#allocation6 + $0x84] ss:$28 sps:$4 sm:$0xff]   ;;  %v1941_v29 = vld [vmem:[#allocation6 + $0x78] ss:$28 sps:$4 sm:$0xff]  }
  0x9a   :  { %v1959_v25 = vld [vmem:[#allocation6 + $0x48] ss:$28 sps:$4 sm:$0xff]   ;;  %510 = vmatprep.subr.bf16.mxu0 %v1957_v24  ;;  %v1966_v30 = vld [vmem:[#allocation6 + $0x80] ss:$28 sps:$4 sm:$0xff]   ;;  %v1946_v31 = vld [vmem:[#allocation6 + $0xb4] ss:$28 sps:$4 sm:$0xff]  }
  0x9b   :  { %v1967_v32 = vld [vmem:[#allocation6 + $0xbc] ss:$28 sps:$4 sm:$0xff]   ;;  %v1949_v33 = vld [vmem:[#allocation6 + $0xec] ss:$28 sps:$4 sm:$0x1f]   ;;  %vm2333_vm3 = vmmov 0  }
  0x9c   :  { %431 = vmatpush1.bf16.msra.mxu1 %v1928_v8  ;;  %v1973_v34 = vld [vmem:[#allocation6 + $0xf4] ss:$28 sps:$4 sm:$0x1f]   ;;  %v1947_v39 = vld [vmem:[#allocation6 + $0xe8] ss:$28 sps:$4 sm:$0x1f]   ;;  %v415_v40 = vand.u32 %v1949_v33, %v2511_v12 }
  0x9d   :  { %432 = vmatprep.subr.bf16.mxu1 %v1929_v10  ;;  %511 = vmatpush1.bf16.msra.mxu0 %v1959_v25  ;;  %v1972_v35 = vld [vmem:[#allocation6 + $0xb8] ss:$28 sps:$4 sm:$0xff]   ;;  %v421_v36 = vand.u32 %v1973_v34, %v2511_v12  ;;  %v1978_v37 = vld [vmem:[#allocation6 + $0xf0] ss:$28 sps:$4 sm:$0x1f]   ;;  %v412_v43 = vand.u32 %v1947_v39, %v2511_v12  ;;  %vm703_vm4 = vcmask 523264  }
  0x9e   :  { %512 = vmatprep.subr.bf16.mxu0 %v1961_v26  ;;  %v1944_v38 = vld [vmem:[#allocation6 + $0xb0] ss:$28 sps:$4 sm:$0xff]   ;;  %v418_v41 = vand.u32 %v1978_v37, %v2511_v12  ;;  %v1982_v44 = vld [vmem:[#allocation9] ss:$8 sps:$4 sm:$0xff]   ;;  %v1988_v45 = vld [vmem:[#allocation9 + $0x14] ss:$8 sps:$4 sm:$0xff]  }
  0x9f   :  { %v1984_v42 = vld [vmem:[#allocation9 + $0x4] ss:$8 sps:$4 sm:$0xff]   ;;  %v1950_v46 = vld [vmem:[#allocation6 + $0x18] ss:$28 sps:$4 sm:$0xff]   ;;  %v1990_v51 = vld [vmem:[#allocation9 + $0x20] ss:$8 sps:$4 sm:$0xff]  }
  0xa0   :  { %433 = vmatpush1.bf16.msra.mxu1 %v1931_v13  ;;  %v1986_v48 = vld [vmem:[#allocation9 + $0x10] ss:$8 sps:$4 sm:$0xff]   ;;  %v1992_v49 = vld [vmem:[#allocation9 + $0x24] ss:$8 sps:$4 sm:$0xff]   ;;  %v1996_v52 = vld [vmem:[#allocation9 + $0x34] ss:$8 sps:$4 sm:$0xff]  }
  0xa1   :  { %434 = vmatprep.subr.bf16.mxu1 %v409_v15  ;;  %513 = vmatpush1.bf16.msra.mxu0 %v1966_v30  ;;  %v1951_v50 = vld [vmem:[#allocation6 + $0x50] ss:$28 sps:$4 sm:$0xff]   ;;  %v1952_v53 = vld [vmem:[#allocation6 + $0x88] ss:$28 sps:$4 sm:$0xff]   ;;  %v1956_v56 = vld [vmem:[#allocation6 + $0xc0] ss:$28 sps:$4 sm:$0xff]  }
  0xa2   :  { %514 = vmatprep.subr.bf16.mxu0 %v1967_v32  ;;  %v1994_v54 = vld [vmem:[#allocation9 + $0x30] ss:$8 sps:$4 sm:$0xff]   ;;  %v2000_v55 = vld [vmem:[#allocation9 + $0x44] ss:$8 sps:$4 sm:$0xff]   ;;  %v1998_v58 = vld [vmem:[#allocation9 + $0x40] ss:$8 sps:$4 sm:$0xff]  }
  0xa3   :  { %v1960_v57 = vld [vmem:[#allocation6 + $0xf8] ss:$28 sps:$4 sm:$0x1f]   ;;  %v2006_v63 = vld [vmem:[#allocation9 + $0x64] ss:$8 sps:$4 sm:$0xff]  }
  0xa4   :  { %435 = vmatpush1.bf16.msra.mxu1 %v406_v16  ;;  %v1965_v59 = vld [vmem:[%s2749_s9 + $0x4] ss:$12 sps:$4 sm:$0xff]   ;;  %v424_v61 = vand.u32 %v1960_v57, %v2511_v12  ;;  %v2001_v62 = vld [vmem:[#allocation9 + $0x50] ss:$8 sps:$4 sm:$0xff]   ;;  %v2012_v8 = vld [vmem:[#allocation9 + $0x84] ss:$8 sps:$4 sm:$0xff]  }
  0xa5   :  { %467 = vmatprep.subr.bf16.mxu1 %v1937_v18  ;;  %515 = vmatpush1.bf16.msra.mxu0 %v1972_v35  ;;  %v2003_v60 = vld [vmem:[#allocation9 + $0x54] ss:$8 sps:$4 sm:$0xff]   ;;  %v1971_v2 = vld [vmem:[%s2749_s9 + $0x1c] ss:$12 sps:$4 sm:$0xff]   ;;  %v2004_v3 = vld [vmem:[#allocation9 + $0x60] ss:$8 sps:$4 sm:$0xff]  }
  0xa6   :  { %516 = vmatprep.subr.bf16.mxu0 %v421_v36  ;;  %v1963_v1 = vld [vmem:[%s2749_s9] ss:$12 sps:$4 sm:$0xff]   ;;  %v1969_v5 = vld [vmem:[%s2749_s9 + $0x18] ss:$12 sps:$4 sm:$0xff]   ;;  %v1975_v9 = vld [vmem:[%s2749_s9 + $0x30] ss:$12 sps:$4 sm:$0xff]   ;;  %v189_v36 = vlaneseq }
  0xa7   :  { %1713 = vmatmul.mubr.msk.bf16.vlgmr.msra.gmra.mrb[0].mxu1 %vm397_vm2, %v2515_v20  ;;  %v2009_v4 = vld [vmem:[#allocation9 + $0x74] ss:$8 sps:$4 sm:$0xff]   ;;  %v1977_v6 = vld [vmem:[%s2749_s9 + $0x34] ss:$12 sps:$4 sm:$0xff]   ;;  %v2010_v11 = vld [vmem:[#allocation9 + $0x80] ss:$8 sps:$4 sm:$0xff]  }
  0xa8   :  { %468 = vmatpush1.bf16.msra.mxu1 %v1935_v19  ;;  %499 = vmatprep.mubr.bf16.mxu1 %v2330_v0  ;;  %v2007_v7 = vld [vmem:[#allocation9 + $0x70] ss:$8 sps:$4 sm:$0xff]   ;;  %v1981_v10 = vld [vmem:[%s2749_s9 + $0x4c] ss:$12 sps:$4 sm:$0xff]   ;;  %v2018_v15 = vld [vmem:[#allocation9 + $0xa4] ss:$8 sps:$4 sm:$0xff]  }
  0xa9   :  { %469 = vmatprep.subr.bf16.mxu1 %v1940_v23  ;;  %517 = vmatpush1.bf16.msra.mxu0 %v418_v41  ;;  %v2015_v12 = vld [vmem:[#allocation9 + $0x94] ss:$8 sps:$4 sm:$0xff]   ;;  %v1979_v13 = vld [vmem:[%s2749_s9 + $0x48] ss:$12 sps:$4 sm:$0xff]   ;;  %v2016_v16 = vld [vmem:[#allocation9 + $0xa0] ss:$8 sps:$4 sm:$0xff]  }
  0xaa   :  { %1205 = vmatprep.subr.bf16.mxu0 %v1984_v42  ;;  %v2013_v14 = vld [vmem:[#allocation9 + $0x90] ss:$8 sps:$4 sm:$0xff]   ;;  %v2021_v17 = vld [vmem:[#allocation9 + $0xb4] ss:$8 sps:$4 sm:$0xff]   ;;  %v2024_v19 = vld [vmem:[#allocation9 + $0xc4] ss:$8 sps:$4 sm:$0xff]  }
  0xab   :  { %v2019_v18 = vld [vmem:[#allocation9 + $0xb0] ss:$8 sps:$4 sm:$0xff]   ;;  %v2027_v21 = vld [vmem:[#allocation9 + $0xd4] ss:$8 sps:$4 sm:$0xff]   ;;  %v2030_v23 = vld [vmem:[#allocation9 + $0xe4] ss:$8 sps:$4 sm:$0xff]  }
  0xac   :  { %470 = vmatpush1.bf16.msra.mxu1 %v1938_v27  ;;  %1715 = vmatmul.mubr.msk.bf16.vlgmr.msra.gmra.mrb[0].mxu0 %vm397_vm2, %v2515_v20  ;;  %v2025_v22 = vld [vmem:[#allocation9 + $0xd0] ss:$8 sps:$4 sm:$0xff]   ;;  %v2028_v24 = vld [vmem:[#allocation9 + $0xe0] ss:$8 sps:$4 sm:$0xff]   ;;  %v2033_v25 = vld [vmem:[#allocation9 + $0xf4] ss:$8 sps:$4 sm:$0xff]  }
  0xad   :  { %471 = vmatprep.subr.bf16.mxu1 %v1943_v28  ;;  %1206 = vmatpush1.bf16.msra.mxu0 %v1982_v44  ;;  %v2031_v26 = vld [vmem:[#allocation9 + $0xf0] ss:$8 sps:$4 sm:$0xff]   ;;  %v2036_v27 = vld [vmem:[#allocation9 + $0x104] ss:$8 sps:$4 sm:$0xff]   ;;  %v1993_v34 = vld [vmem:[%s2749_s9 + $0x38] ss:$12 sps:$4 sm:$0xff]  }
  0xae   :  { %1207 = vmatprep.subr.bf16.mxu0 %v1988_v45  ;;  %v597_v28 = vld [vmem:[#allocation4] sm:$0xff]  ;;  %v1997_v35 = vld [vmem:[%s2749_s9 + $0x50] ss:$12 sps:$4 sm:$0xff]   ;;  %v2587_v37 = vshrl.u32 %v189_v36, 7 }
  0xaf   :  { %v1989_v33 = vld [vmem:[%s2749_s9 + $0x20] ss:$12 sps:$4 sm:$0xff]   ;;  %v2040_v57 = vld [vmem:[#allocation9 + $0x120] ss:$8 sps:$4 sm:$0xff]  }
  0xb0   :  { %472 = vmatpush1.bf16.msra.mxu1 %v1941_v29  ;;  %v2592_v39 = vld [vmem:[#allocation7] sm:$0xff] }
  0xb1   :  { %473 = vmatprep.subr.bf16.mxu1 %v1946_v31  ;;  %1208 = vmatpush1.bf16.msra.mxu0 %v1986_v48  ;;  %v1985_v31 = vld [vmem:[%s2749_s9 + $0x8] ss:$12 sps:$4 sm:$0xff]  }
  0xb2   :  { %1209 = vmatprep.subr.bf16.mxu0 %v1992_v49 }
  0xb4   :  { %474 = vmatpush1.bf16.msra.mxu1 %v1944_v38  ;;  %v2590_v38 = vsub.s32 0, %v2587_v37 }
  0xb5   :  { %475 = vmatprep.subr.bf16.mxu1 %v415_v40  ;;  %1210 = vmatpush1.bf16.msra.mxu0 %v1990_v51  ;;  %v2595_v40 = vsub.s32 1, %v2587_v37 }
  0xb6   :  { %1211 = vmatprep.subr.bf16.mxu0 %v1996_v52  ;;  %v192_v41 = vrot.slane %v2592_v39, %v2590_v38  ;;  %v2034_v52 = vld [vmem:[#allocation9 + $0x100] ss:$8 sps:$4 sm:$0xff]  }
  0xb7   :  { %v196_v42 = vrot.slane %v2592_v39, %v2595_v40 }
  0xb8   :  { %476 = vmatpush1.bf16.msra.mxu1 %v412_v43 }
  0xb9   :  { %1865 = vmatprep.subr.bf16.mxu1 %v2332_v47  ;;  %1212 = vmatpush1.bf16.msra.mxu0 %v1994_v54  ;;  %v2039_v54 = vld [vmem:[#allocation9 + $0x114] ss:$8 sps:$4 sm:$0xff]  }
  0xba   :  { %1213 = vmatprep.subr.bf16.mxu0 %v2000_v55  ;;  %v2037_v55 = vld [vmem:[#allocation9 + $0x110] ss:$8 sps:$4 sm:$0xff]  }
  0xbb   :  { %1714 = vmatmul.mubr.msk.bf16.vlgmr.msra.gmra.mrb[4].mxu1 %vm397_vm2, %v2515_v20 }
  0xbc   :  { %1866 = vmatpush3.bf16.msra.mxu1 %v1950_v46  ;;  %1875 = vmatprep.mubr.msk.bf16.mxu1 %vm2333_vm3, %v2332_v47 }
  0xbd   :  { %1867 = vmatprep.subr.bf16.mxu1 %v2332_v47  ;;  %1214 = vmatpush1.bf16.msra.mxu0 %v1998_v58  ;;  %v203_v58 = vsub.s32 3, %v2587_v37 }
  0xbe   :  { %1215 = vmatprep.subr.bf16.mxu0 %v2003_v60  ;;  %v2043_v60 = vld [vmem:[#allocation9 + $0x130] ss:$8 sps:$4 sm:$0xff]  }
  0xc0   :  { %1868 = vmatpush3.bf16.msra.mxu1 %v1951_v50 }
  0xc1   :  { %1869 = vmatprep.subr.bf16.mxu1 %v2332_v47  ;;  %1216 = vmatpush1.bf16.msra.mxu0 %v2001_v62 }
  0xc2   :  { %1217 = vmatprep.subr.bf16.mxu0 %v2006_v63  ;;  %v2048_v63 = vld [vmem:[#allocation9 + $0x144] ss:$8 sps:$4 sm:$0xff]  }
  0xc4   :  { %1870 = vmatpush3.bf16.msra.mxu1 %v1952_v53 }
  0xc5   :  { %1871 = vmatprep.subr.bf16.mxu1 %v2332_v47  ;;  %1218 = vmatpush1.bf16.msra.mxu0 %v2004_v3 }
  0xc6   :  { %1219 = vmatprep.subr.bf16.mxu0 %v2009_v4 }
  0xc8   :  { %1872 = vmatpush3.bf16.msra.mxu1 %v1956_v56  ;;  %v2042_v56 = vld [vmem:[#allocation9 + $0x124] ss:$8 sps:$4 sm:$0xff]  }
  0xc9   :  { %1873 = vmatprep.subr.bf16.mxu1 %v2332_v47  ;;  %1220 = vmatpush1.bf16.msra.mxu0 %v2007_v7  ;;  %v2051_v7 = vld [vmem:[#allocation9 + $0x154] ss:$8 sps:$4 sm:$0xff]  }
  0xca   :  { %1221 = vmatprep.subr.bf16.mxu0 %v2012_v8 }
  0xcc   :  { %1874 = vmatpush3.bf16.msra.mxu1 %v424_v61  ;;  %v204_v61 = vrot.slane %v2592_v39, %v203_v58 }
  0xcd   :  { %707 = vmatprep.subr.bf16.mxu1 %v1965_v59  ;;  %1222 = vmatpush1.bf16.msra.mxu0 %v2010_v11  ;;  %v2045_v59 = vld [vmem:[#allocation9 + $0x134] ss:$8 sps:$4 sm:$0xff]  }
  0xce   :  { %1223 = vmatprep.subr.bf16.mxu0 %v2015_v12  ;;  %v2082_v11 = vld [vmem:[%s2747_s7 + $0x40] sm:$0xff]  }
  0xcf   :  { %1876 = vmatmul.mubr.msk.bf16.vlgmr.msra.gmra.mrb[8].mxu1 %vm397_vm2, %v2515_v20  ;;  %v2022_v20 = vld [vmem:[#allocation9 + $0xc0] ss:$8 sps:$4 sm:$0xff]   ;;  %v2083_v12 = vld [vmem:[%s2747_s7] sm:$0xff]  }
  0xd0   :  { %708 = vmatpush1.bf16.msra.mxu1 %v1963_v1  ;;  %739 = vmatprep.mubr.bf16.mxu1 %v2330_v0 }
  0xd1   :  { %709 = vmatprep.subr.bf16.mxu1 %v1971_v2  ;;  %1224 = vmatpush1.bf16.msra.mxu0 %v2013_v14 }
  0xd2   :  { %1225 = vmatprep.subr.bf16.mxu0 %v2018_v15  ;;  %v2049_v15 = vld [vmem:[#allocation9 + $0x150] ss:$8 sps:$4 sm:$0xff]  }
  0xd4   :  { %710 = vmatpush1.bf16.msra.mxu1 %v1969_v5 }
  0xd5   :  { %711 = vmatprep.subr.bf16.mxu1 %v1977_v6  ;;  %1226 = vmatpush1.bf16.msra.mxu0 %v2016_v16  ;;  %v2046_v6 = vld [vmem:[#allocation9 + $0x140] ss:$8 sps:$4 sm:$0xff]  }
  0xd6   :  { %1227 = vmatprep.subr.bf16.mxu0 %v2021_v17  ;;  %v2085_v17 = vld [vmem:[%s2747_s7 + $0x8] sm:$0xff]  }
  0xd8   :  { %712 = vmatpush1.bf16.msra.mxu1 %v1975_v9 }
  0xd9   :  { %713 = vmatprep.subr.bf16.mxu1 %v1981_v10  ;;  %1228 = vmatpush1.bf16.msra.mxu0 %v2019_v18  ;;  %v2054_v18 = vld [vmem:[#allocation9 + $0x164] ss:$8 sps:$4 sm:$0xff]  }
  0xda   :  { %1229 = vmatprep.subr.bf16.mxu0 %v2024_v19  ;;  %v2086_v19 = vld [vmem:[%s2747_s7 + $0x50] sm:$0xff]  }
  0xdc   :  { %714 = vmatpush1.bf16.msra.mxu1 %v1979_v13  ;;  %v2084_v13 = vld [vmem:[%s2747_s7 + $0x48] sm:$0xff]  }
  0xdd   :  { %1879 = vmatprep.subr.bf16.mxu1 %v2332_v47  ;;  %1230 = vmatpush1.bf16.msra.mxu0 %v2022_v20  ;;  %v2052_v20 = vld [vmem:[#allocation9 + $0x160] ss:$8 sps:$4 sm:$0xff]  }
  0xde   :  { %1231 = vmatprep.subr.bf16.mxu0 %v2027_v21  ;;  %v2087_v21 = vld [vmem:[%s2747_s7 + $0x10] sm:$0xff]  }
  0xe1   :  { %1232 = vmatpush1.bf16.msra.mxu0 %v2025_v22  ;;  %v2057_v22 = vld [vmem:[#allocation9 + $0x174] ss:$8 sps:$4 sm:$0xff]  }
  0xe2   :  { %1233 = vmatprep.subr.bf16.mxu0 %v2030_v23  ;;  %v2088_v23 = vld [vmem:[%s2747_s7 + $0x58] sm:$0xff]  }
  0xe5   :  { %1234 = vmatpush1.bf16.msra.mxu0 %v2028_v24  ;;  %v2055_v24 = vld [vmem:[#allocation9 + $0x170] ss:$8 sps:$4 sm:$0xff]  }
  0xe6   :  { %1235 = vmatprep.subr.bf16.mxu0 %v2033_v25  ;;  %v2089_v25 = vld [vmem:[%s2747_s7 + $0x18] sm:$0xff]  }
  0xe9   :  { %1236 = vmatpush1.bf16.msra.mxu0 %v2031_v26  ;;  %v2060_v26 = vld [vmem:[#allocation9 + $0x184] ss:$8 sps:$4 sm:$0xff]  }
  0xea   :  { %1246 = vmatprep.subr.bf16.mxu0 %v2036_v27  ;;  %v2090_v27 = vld [vmem:[%s2747_s7 + $0x60] sm:$0xff]  }
 0x115   :  { %v602_v29 = vpop.permute.xlu0 %601 }
 0x116   :  { %v2564_v30 = vmul.f32 %v602_v29, %v597_v28  ;;  %v2058_v28 = vld [vmem:[#allocation9 + $0x180] ss:$8 sps:$4 sm:$0xff]   ;;  %v2091_v29 = vld [vmem:[%s2747_s7 + $0x20] sm:$0xff]  }
 0x118   :  { %v605_v32 = vpack.c.bf16 %v2564_v30, %v2564_v30 }
 0x11a   :  { %1729 = vmatmul.mubr.msk.bf16.vlgmr.msra.gmra.mrb[12].mxu1 %vm703_vm4, %v605_v32 }
 0x11b   :  { %1880 = vmatpush3.bf16.msra.mxu1 %v1985_v31  ;;  %1887 = vmatprep.mubr.msk.bf16.mxu1 %vm2333_vm3, %v2332_v47  ;;  %v2063_v31 = vld [vmem:[#allocation9 + $0x194] ss:$8 sps:$4 sm:$0xff]  }
 0x11c   :  { %1881 = vmatprep.subr.bf16.mxu1 %v2332_v47 }
 0x11f   :  { %1882 = vmatpush3.bf16.msra.mxu1 %v1989_v33 }
 0x120   :  { %1883 = vmatprep.subr.bf16.mxu1 %v2332_v47 }
 0x123   :  { %1884 = vmatpush3.bf16.msra.mxu1 %v1993_v34 }
 0x124   :  { %1885 = vmatprep.subr.bf16.mxu1 %v2332_v47 }
 0x127   :  { %1886 = vmatpush3.bf16.msra.mxu1 %v1997_v35  ;;  %v2061_v35 = vld [vmem:[#allocation9 + $0x190] ss:$8 sps:$4 sm:$0xff]  }
 0x128   :  { %1843 = vmatprep.subr.bf16.mxu1 %v2082_v11 }
 0x12a   :  { %1888 = vmatmul.mubr.msk.bf16.vlgmr.msra.gmra.mrb[16].mxu1 %vm703_vm4, %v605_v32  ;;  %v2092_v32 = vld [vmem:[%s2747_s7 + $0x68] sm:$0xff]  }
 0x12b   :  { %1844 = vmatpush3.bf16.msra.mxu1 %v2083_v12 }
 0x12c   :  { %1845 = vmatprep.subr.bf16.mxu1 %v2084_v13 }
 0x12f   :  { %1846 = vmatpush3.bf16.msra.mxu1 %v2085_v17 }
 0x130   :  { %1847 = vmatprep.subr.bf16.mxu1 %v2086_v19 }
 0x133   :  { %1848 = vmatpush3.bf16.msra.mxu1 %v2087_v21  ;;  %v215_v21 = vsub.s32 6, %v2587_v37 }
 0x134   :  { %1849 = vmatprep.subr.bf16.mxu1 %v2088_v23 }
 0x137   :  { %1850 = vmatpush3.bf16.msra.mxu1 %v2089_v25  ;;  %v216_v25 = vrot.slane %v2592_v39, %v215_v21 }
 0x138   :  { %1851 = vmatprep.subr.bf16.mxu1 %v2090_v27 }
 0x13b   :  { %1852 = vmatpush3.bf16.msra.mxu1 %v2091_v29 }
 0x13c   :  { %1853 = vmatprep.subr.bf16.mxu1 %v2092_v32 }
 0x17a   :  { %v460_v43 = vpop.f32.mrb[0].mxu1 }
 0x17b   :  { %v461_v44 = vadd.f32 %v460_v43, %v192_v41  ;;  %v462_v45 = vpop.f32.mrb[1].mxu1  ;;  %v2093_v41 = vld [vmem:[%s2747_s7 + $0x28] sm:$0xff]  }
 0x17c   :  { %v463_v46 = vadd.f32 %v462_v45, %v196_v42  ;;  %v464_v47 = vpop.f32.mrb[2].mxu1  ;;  %v2066_v42 = vld [vmem:[#allocation9 + $0x1a4] ss:$8 sps:$4 sm:$0xff]   ;;  %1854 = vmatpush3.bf16.msra.mxu1 %v2093_v41  ;;  %v2069_v45 = vld [vmem:[#allocation9 + $0x1b4] ss:$8 sps:$4 sm:$0xff]  }
 0x17d   :  { %v589_v48 = vmax.f32 %v461_v44, 0.0  ;;  %v465_v49 = vpop.f32.mrb[3].mxu1  ;;  %v2064_v44 = vld [vmem:[#allocation9 + $0x1a0] ss:$8 sps:$4 sm:$0xff]   ;;  %v2072_v47 = vld [vmem:[#allocation9 + $0x1c4] ss:$8 sps:$4 sm:$0xff]  }
 0x17e   :  { %v590_v50 = vmax.f32 %v463_v46, 0.0  ;;  %v2067_v46 = vld [vmem:[#allocation9 + $0x1b0] ss:$8 sps:$4 sm:$0xff]   ;;  %v199_v49 = vsub.s32 2, %v2587_v37 }
 0x17f   :  { %v593_v53 = vpack.c.bf16 %v589_v48, %v589_v48  ;;  %v2603_v62 = vpop.f32.mrb[0].mxu0  ;;  %v2070_v48 = vld [vmem:[#allocation9 + $0x1c0] ss:$8 sps:$4 sm:$0xff]  }
 0x180   :  { %v594_v51 = vpack.c.bf16 %v590_v50, %v590_v50  ;;  %v2605_v1 = vpop.f32.mrb[1].mxu0  ;;  %v2075_v50 = vld [vmem:[#allocation9 + $0x1d4] ss:$8 sps:$4 sm:$0xff]  }
 0x181   :  { %v546_v3 = vpop.f32.mrb[2].mxu0 }
 0x182   :  { %1237 = vmatprep.mubr.bf16.mxu0 %v594_v51  ;;  %v547_v5 = vpop.f32.mrb[3].mxu0  ;;  %v2073_v51 = vld [vmem:[#allocation9 + $0x1d0] ss:$8 sps:$4 sm:$0xff]  }
 0x183   :  { %1238 = vmatmul.mubr.bf16.vlgmr.msra.gmra.mrb[4].mxu0 %v593_v53  ;;  %v2078_v53 = vld [vmem:[#allocation9 + $0x1e4] ss:$8 sps:$4 sm:$0xff]   ;;  %v622_v3 = vld [vmem:[%s2750_s10] sm:$0x7] }
 0x184   :  { %1247 = vmatpush1.bf16.msra.mxu0 %v2034_v52  ;;  %v200_v52 = vrot.slane %v2592_v39, %v199_v49  ;;  %v627_v5 = vrot.slane %v622_v3, %v2590_v38 }
 0x185   :  { %1248 = vmatprep.subr.bf16.mxu0 %v2039_v54  ;;  %v2076_v54 = vld [vmem:[#allocation9 + $0x1e0] ss:$8 sps:$4 sm:$0xff]  }
 0x188   :  { %1249 = vmatpush1.bf16.msra.mxu0 %v2037_v55 }
 0x189   :  { %1250 = vmatprep.subr.bf16.mxu0 %v2042_v56  ;;  %v2081_v56 = vld [vmem:[#allocation9 + $0x1f4] ss:$8 sps:$4 sm:$0xff]  }
 0x18c   :  { %1251 = vmatpush1.bf16.msra.mxu0 %v2040_v57  ;;  %v2079_v57 = vld [vmem:[#allocation9 + $0x1f0] ss:$8 sps:$4 sm:$0xff]  }
 0x18d   :  { %1252 = vmatprep.subr.bf16.mxu0 %v2045_v59 }
 0x18e   :  { %v2607_v2 = vpop.f32.mrb[4].mxu1 }
 0x18f   :  { %v503_v4 = vpop.f32.mrb[5].mxu1  ;;  %v502_v55 = vadd.f32 %v2607_v2, %v200_v52 }
 0x190   :  { %1253 = vmatpush1.bf16.msra.mxu0 %v2043_v60  ;;  %v504_v8 = vadd.f32 %v503_v4, %v204_v61  ;;  %v505_v9 = vpop.f32.mrb[6].mxu1  ;;  %v207_v60 = vsub.s32 4, %v2587_v37  ;;  %v211_v61 = vsub.s32 5, %v2587_v37  ;;  %v2095_v37 = vld [vmem:[%s2747_s7 + $0x30] sm:$0xff]  }
 0x191   :  { %1254 = vmatprep.subr.bf16.mxu0 %v2048_v63  ;;  %v506_v10 = vpop.f32.mrb[7].mxu1  ;;  %v591_v58 = vmax.f32 %v502_v55, 0.0 }
 0x192   :  { %v592_v14 = vmax.f32 %v504_v8, 0.0  ;;  %v208_v63 = vrot.slane %v2592_v39, %v207_v60  ;;  %v212_v2 = vrot.slane %v2592_v39, %v211_v61  ;;  %v2101_v60 = vld [vmem:[%s2752_s12 + $0x10] ss:$8 sps:$4 sm:$0xff]   ;;  %v2106_v61 = vld [vmem:[%s2752_s12 + $0x24] ss:$8 sps:$4 sm:$0xff]  }
 0x193   :  { %v595_v59 = vpack.c.bf16 %v591_v58, %v591_v58 }
 0x194   :  { %1255 = vmatpush1.bf16.msra.mxu0 %v2046_v6  ;;  %v596_v16 = vpack.c.bf16 %v592_v14, %v592_v14  ;;  %v543_v4 = vadd.f32 %v2603_v62, %v208_v63  ;;  %v545_v6 = vadd.f32 %v2605_v1, %v212_v2  ;;  %v2104_v63 = vld [vmem:[%s2752_s12 + $0x20] ss:$8 sps:$4 sm:$0xff]   ;;  %v2107_v2 = vld [vmem:[%s2752_s12 + $0x30] ss:$8 sps:$4 sm:$0xff]  }
 0x195   :  { %1256 = vmatprep.subr.bf16.mxu0 %v2051_v7  ;;  %v631_v7 = vrot.slane %v622_v3, %v2595_v40 }
 0x196   :  { %1278 = vmatprep.mubr.bf16.mxu0 %v596_v16  ;;  %v1892_v8 = vadd.f32 %v627_v5, %v543_v4  ;;  %v2112_v4 = vld [vmem:[%s2751_s11 + $0x4] ss:$8 sps:$4 sm:$0xff]  }
 0x197   :  { %v1895_v9 = vadd.f32 %v631_v7, %v545_v6  ;;  %v1797_v6 = vld [vmem:[#allocation12] ss:$0 sm:$0xff] }
 0x198   :  { %1257 = vmatpush1.bf16.msra.mxu0 %v2049_v15 }
 0x199   :  { %1258 = vmatprep.subr.bf16.mxu0 %v2054_v18 }
 0x19c   :  { %1259 = vmatpush1.bf16.msra.mxu0 %v2052_v20 }
 0x19d   :  { %1260 = vmatprep.subr.bf16.mxu0 %v2057_v22 }
 0x1a0   :  { %1261 = vmatpush1.bf16.msra.mxu0 %v2055_v24  ;;  %v635_v24 = vrot.slane %v622_v3, %v199_v49  ;;  %v2109_v3 = vld [vmem:[%s2752_s12 + $0x34] ss:$8 sps:$4 sm:$0xff]  }
 0x1a1   :  { %1262 = vmatprep.subr.bf16.mxu0 %v2060_v26 }
 0x1a2   :  { %v2642_v33 = vpop.f32.mrb[8].mxu1 }
 0x1a3   :  { %v1877_v34 = vpop.f32.mrb[9].mxu1 }
 0x1a4   :  { %1263 = vmatpush1.bf16.msra.mxu0 %v2058_v28  ;;  %v586_v36 = vpop.f32.mrb[10].mxu1  ;;  %v584_v28 = vadd.f32 %v2642_v33, %v216_v25  ;;  %v2096_v33 = vld [vmem:[%s2747_s7 + $0x78] sm:$0xff]  }
 0x1a5   :  { %1264 = vmatprep.subr.bf16.mxu0 %v2063_v31  ;;  %v1878_v43 = vpop.f32.mrb[11].mxu1  ;;  %v2097_v36 = vld [vmem:[%s2747_s7 + $0x38] sm:$0xff]  }
 0x1a8   :  { %1265 = vmatpush1.bf16.msra.mxu0 %v2061_v35  ;;  %v2094_v35 = vld [vmem:[%s2747_s7 + $0x70] sm:$0xff]  }
 0x1a9   :  { %1266 = vmatprep.subr.bf16.mxu0 %v2066_v42  ;;  %1855 = vmatprep.subr.bf16.mxu1 %v2094_v35 }
 0x1aa   :  { %1856 = vmatpush3.bf16.msra.mxu1 %v2095_v37 }
 0x1ab   :  { %1857 = vmatprep.subr.bf16.mxu1 %v2096_v33 }
 0x1ac   :  { %1267 = vmatpush1.bf16.msra.mxu0 %v2064_v44 }
 0x1ad   :  { %1268 = vmatprep.subr.bf16.mxu0 %v2069_v45  ;;  %v2100_v45 = vld [vmem:[%s2752_s12 + $0x4] ss:$8 sps:$4 sm:$0xff]  }
 0x1ae   :  { %1858 = vmatpush3.bf16.msra.mxu1 %v2097_v36 }
 0x1af   :  { %1528 = vmatprep.subr.bf16.mxu1 %v2100_v45 }
 0x1b0   :  { %1269 = vmatpush1.bf16.msra.mxu0 %v2067_v46  ;;  %v873_v46 = vld [vmem:[#allocation10] sm:$0x3] }
 0x1b1   :  { %1270 = vmatprep.subr.bf16.mxu0 %v2072_v47  ;;  %v878_v47 = vrot.slane %v873_v46, %v2590_v38 }
 0x1b4   :  { %1271 = vmatpush1.bf16.msra.mxu0 %v2070_v48  ;;  %v882_v48 = vrot.slane %v873_v46, %v2595_v40 }
 0x1b5   :  { %1272 = vmatprep.subr.bf16.mxu0 %v2075_v50 }
 0x1b8   :  { %1273 = vmatpush1.bf16.msra.mxu0 %v2073_v51 }
 0x1b9   :  { %1274 = vmatprep.subr.bf16.mxu0 %v2078_v53 }
 0x1bc   :  { %1275 = vmatpush1.bf16.msra.mxu0 %v2076_v54 }
 0x1bd   :  { %1276 = vmatprep.subr.bf16.mxu0 %v2081_v56 }
 0x1c0   :  { %1277 = vmatpush1.bf16.msra.mxu0 %v2079_v57  ;;  %v2098_v57 = vld [vmem:[%s2752_s12] ss:$8 sps:$4 sm:$0xff]  }
 0x1c3   :  { %1279 = vmatmul.mubr.bf16.vlgmr.msra.gmra.mrb[4].mxu0 %v595_v59  ;;  %v2103_v59 = vld [vmem:[%s2752_s12 + $0x14] ss:$8 sps:$4 sm:$0xff]  }
 0x1ed   :  { %v741_v10 = vpop.f32.mrb[12].mxu1 }
 0x1ee   :  { %v1893_v11 = vadd.f32 %v1892_v8, %v741_v10  ;;  %v743_v12 = vpop.f32.mrb[13].mxu1 }
 0x1ef   :  { %v1896_v13 = vadd.f32 %v1895_v9, %v743_v12  ;;  %v745_v14 = vpop.f32.mrb[14].mxu1 }
 0x1f0   :  { %v1731_v15 = vmul.f32 -1.442695, %v1893_v11  ;;  %v746_v16 = vpop.f32.mrb[15].mxu1 }
 0x1f1   :  { %v1732_v17 = vmul.f32 -1.442695, %v1896_v13  ;;  %v2110_v13 = vld [vmem:[%s2751_s11] ss:$8 sps:$4 sm:$0xff]   ;;  %v2113_v16 = vld [vmem:[%s2751_s11 + $0x10] ss:$8 sps:$4 sm:$0xff]  }
 0x1f2   :  { %2122 = vpow2.f32 %v1731_v15  ;;  %v2115_v15 = vld [vmem:[%s2751_s11 + $0x14] ss:$8 sps:$4 sm:$0xff]  }
 0x1f3   :  { %2124 = vpow2.f32 %v1732_v17  ;;  %v2118_v17 = vld [vmem:[%s2751_s11 + $0x24] ss:$8 sps:$4 sm:$0xff]  }
 0x1fc   :  { %v2123_v18 = vpop.eup %2122 }
 0x1fd   :  { %v792_v62 = vadd.f32 1.0, %v2123_v18  ;;  %v782_v19 = vpop.f32.mrb[16].mxu1  ;;  %v2125_v23 = vpop.eup %2124  ;;  %v2116_v18 = vld [vmem:[%s2751_s11 + $0x20] ss:$8 sps:$4 sm:$0xff]  }
 0x1fe   :  { %v1889_v20 = vpop.f32.mrb[17].mxu1  ;;  %v799_v26 = vadd.f32 1.0, %v2125_v23  ;;  %v783_v27 = vadd.f32 %v782_v19, %v635_v24  ;;  %v1653_v23 = vld [vmem:[#allocation13] sm:$0x3] }
 0x1ff   :  { %2126 = vrcp.f32 %v792_v62  ;;  %v785_v1 = vpop.f32.mrb[18].mxu1  ;;  %v2121_v62 = vld [vmem:[%s2751_s11 + $0x34] ss:$8 sps:$4 sm:$0xff]   ;;  %v1658_v24 = vrot.slane %v1653_v23, %v2590_v38 }
 0x200   :  { %v1890_v22 = vpop.f32.mrb[19].mxu1  ;;  %2128 = vrcp.f32 %v799_v26  ;;  %v1662_v26 = vrot.slane %v1653_v23, %v2595_v40 }
 0x209   :  { %v2127_v29 = vpop.eup %2126 }
 0x20a   :  { %v802_v31 = vmul.f32 %v2127_v29, %v783_v27  ;;  %v2129_v34 = vpop.eup %2128 }
 0x20b   :  { %v805_v39 = vsub.f32 1.0, %v2129_v34  ;;  %v807_v41 = vmul.f32 %v2129_v34, %v2564_v30 }
 0x20c   :  { %v803_v32 = vadd.f32 %v802_v31, %v584_v28 }
 0x20e   :  { %2130 = vtanh.f32 %v803_v32 }
 0x218   :  { %v2131_v42 = vpop.eup %2130 }
 0x219   :  { %v806_v43 = vmul.f32 %v2131_v42, %v805_v39 }
 0x21b   :  { %v808_v44 = vadd.f32 %v807_v41, %v806_v43 }
 0x21d   :  { %v1468_v19 = vpack.c.bf16 %v808_v44, %v808_v44 }
 0x296   :  { %v1280_v49 = vpop.f32.mrb[4].mxu0 }
 0x297   :  { %v1897_v50 = vadd.f32 %v1280_v49, %v878_v47  ;;  %v1282_v51 = vpop.f32.mrb[5].mxu0 }
 0x298   :  { %v1898_v52 = vadd.f32 %v1282_v51, %v882_v48  ;;  %v1284_v30 = vpop.f32.mrb[6].mxu0 }
 0x299   :  { %v1287_v53 = vmax.f32 %v1897_v50, 0.0  ;;  %v1285_v54 = vpop.f32.mrb[7].mxu0 }
 0x29a   :  { %v1288_v55 = vmax.f32 %v1898_v52, 0.0 }
 0x29b   :  { %v1289_v58 = vpack.c.bf16 %v1287_v53, %v1287_v53 }
 0x29c   :  { %v1290_v56 = vpack.c.bf16 %v1288_v55, %v1288_v55 }
 0x29e   :  { %1458 = vmatprep.mubr.bf16.mxu1 %v1290_v56 }
 0x29f   :  { %1459 = vmatmul.mubr.bf16.vlgmr.msra.gmra.mrb[20].mxu1 %v1289_v58 }
 0x2a0   :  { %1529 = vmatpush1.bf16.msra.mxu1 %v2098_v57  ;;  %1560 = vmatprep.mubr.bf16.mxu1 %v2330_v0 }
 0x2a1   :  { %1530 = vmatprep.subr.bf16.mxu1 %v2103_v59 }
 0x2a4   :  { %1531 = vmatpush1.bf16.msra.mxu1 %v2101_v60 }
 0x2a5   :  { %1532 = vmatprep.subr.bf16.mxu1 %v2106_v61 }
 0x2a8   :  { %1533 = vmatpush1.bf16.msra.mxu1 %v2104_v63 }
 0x2a9   :  { %1534 = vmatprep.subr.bf16.mxu1 %v2109_v3 }
 0x2ac   :  { %1535 = vmatpush1.bf16.msra.mxu1 %v2107_v2 }
 0x2ad   :  { %1612 = vmatprep.subr.bf16.mxu1 %v2112_v4 }
 0x372   :  { %v1859_v5 = vpop.f32.mrb[20].mxu1 }
 0x373   :  { %v1860_v7 = vpop.f32.mrb[21].mxu1 }
 0x374   :  { %v1861_v8 = vadd.f32 %v1860_v7, %v1859_v5  ;;  %v1862_v9 = vpop.f32.mrb[22].mxu1 }
 0x375   :  { %v1863_v10 = vpop.f32.mrb[23].mxu1 }
 0x376   :  { %v1461_v11 = vadd.f32 %v1861_v8, %v1797_v6 }
 0x378   :  { %v1466_v12 = vmax.f32 %v1461_v11, 0.0 }
 0x37a   :  { %v1467_v14 = vpack.c.bf16 %v1466_v12, %v1466_v12 }
 0x37c   :  { %1822 = vmatmul.mubr.msk.bf16.vlgmr.msra.gmra.mrb[24].mxu1 %vm703_vm4, %v1467_v14 }
 0x37d   :  { %1613 = vmatpush1.bf16.msra.mxu1 %v2110_v13  ;;  %1644 = vmatprep.mubr.bf16.mxu1 %v2330_v0  ;;  %v2119_v0 = vld [vmem:[%s2751_s11 + $0x30] ss:$8 sps:$4 sm:$0xff]  }
 0x37e   :  { %1614 = vmatprep.subr.bf16.mxu1 %v2115_v15 }
 0x381   :  { %1615 = vmatpush1.bf16.msra.mxu1 %v2113_v16 }
 0x382   :  { %1616 = vmatprep.subr.bf16.mxu1 %v2118_v17 }
 0x385   :  { %1617 = vmatpush1.bf16.msra.mxu1 %v2116_v18 }
 0x386   :  { %1618 = vmatprep.subr.bf16.mxu1 %v2121_v62 }
 0x389   :  { %1619 = vmatpush1.bf16.msra.mxu1 %v2119_v0 }
 0x38c   :  { %1831 = vmatmul.mubr.msk.bf16.vlgmr.msra.gmra.mrb[28].mxu1 %vm703_vm4, %v1468_v19 }
 0x44f   :  { %v1562_v20 = vpop.f32.mrb[24].mxu1 }
 0x450   :  { %v1564_v1 = vpop.f32.mrb[25].mxu1 }
 0x451   :  { %v1566_v21 = vpop.f32.mrb[26].mxu1 }
 0x452   :  { %v1567_v22 = vpop.f32.mrb[27].mxu1 }
 0x45f   :  { %v1646_v25 = vpop.f32.mrb[28].mxu1 }
 0x460   :  { %v1647_v27 = vadd.f32 %v1646_v25, %v1562_v20  ;;  %v1648_v28 = vpop.f32.mrb[29].mxu1 }
 0x461   :  { %v1649_v29 = vadd.f32 %v1648_v28, %v1564_v1  ;;  %v1650_v31 = vpop.f32.mrb[30].mxu1 }
 0x462   :  { %v1665_v32 = vadd.f32 %v1658_v24, %v1647_v27  ;;  %v1651_v34 = vpop.f32.mrb[31].mxu1 }
 0x463   :  { %v1666_v35 = vadd.f32 %v1662_v26, %v1649_v29 }
 0x464   :  { %1667 = vst [vmem:[%s2754_s14] sm:$0xff] %v1665_v32 }
 0x465   :  { %1668 = vst.msk [vmem:[%s2754_s14 + $0x8] sm:$0xff] %vm703_vm4, %v1666_v35 }
 0x466   :  { %1673 = vsyncpa [#allocation3], 1 }
 0x467   :  { %1674 = vsyncpa [#allocation5], 1 }
 0x468   :  { %1675 = vsyncpa [#allocation8], 1 }
 0x469   :  { %1676 = vsyncpa [#allocation11], 1 }
 0x46a   :  { %1677 = vsyncpa [#allocation14], 1 }

</bundles_post_ra>
